<compile_context>
chip_gen: v7x
topology: tpu7x:2x2x1
jax: 0.10.0
libtpu: 0.0.40
codegen_flags: <defaults>
</compile_context>

<pallas_src>
import functools

import jax
import jax.numpy as jnp
from jax.experimental import pallas as pl
from jax.experimental.pallas import tpu as pltpu

IN_FEATURES = 768
NUM_CLASSES = 2
DROPOUT_P = 0.5      # F.dropout default
NUM_CORES = 2        # v7x has 2 TensorCores; extra partial is harmless on v5e/v6e


def _round_up(n, m):
    return ((n + m - 1) // m) * m


def _rel_kernel(x_ref, w_ref, b_ref, *rest, apply_dropout: bool, batch: int, tb: int,
                tpc: int, has_bits: bool, bits_is_u8: bool, bits_threshold: int,
                use_onchip_prng: bool, seed: int, need_mask: bool):
    # x_ref: (tb, 768) f32/bf16   w_ref: (768, 2)   b_ref: (1, 2) f32
    # optional bits_ref: (tb, 768) uint8/uint32     o_ref: (1, 1, 2) f32 (per-core,
    # resident across the reduction axis -> used directly as the accumulator)
    if has_bits:
        bits_ref, o_ref = rest
    else:
        (o_ref,) = rest

    c = pl.program_id(0)          # core axis ("parallel")
    i = pl.program_id(1)          # batch-tile axis ("arbitrary" reduction)

    @pl.when(i == 0)
    def _init():
        o_ref[...] = jnp.zeros_like(o_ref)

    x = x_ref[...]                # native dtype; no widening copy

    if apply_dropout:
        if use_onchip_prng:
            # independent stream per (core, tile) grid step; zero extra HBM traffic
            pltpu.prng_seed(seed + c * tpc + i)
            rbits = pltpu.prng_random_bits((tb, IN_FEATURES))
            if rbits.dtype != jnp.uint32:
                rbits = pltpu.bitcast(rbits, jnp.uint32)
            keep = rbits >= jnp.uint32(bits_threshold)
        elif bits_is_u8:
            keep = bits_ref[...].astype(jnp.int32) >= bits_threshold
        else:
            keep = bits_ref[...] >= jnp.uint32(bits_threshold)
        x = jnp.where(keep, x, jnp.zeros_like(x))

    # Linear on the MXU; 1/(1-p) survivor scale is pre-folded into w by the wrapper.
    z = jnp.dot(x, w_ref[...], preferred_element_type=jnp.float32) + b_ref[...]

    # numerically-stable softmax over the 2 classes (cheap filler under the DMA)
    m = jnp.max(z, axis=1, keepdims=True)
    e = jnp.exp(z - m)
    probs = e / jnp.sum(e, axis=1, keepdims=True)

    if need_mask:
        # zero rows past the true batch (partial last block / clamped duplicate tile);
        # select (not multiply) after the softmax so garbage/NaN rows cannot leak
        gt = c * tpc + i
        row = gt * tb + jax.lax.broadcasted_iota(jnp.int32, (tb, 1), 0)
        probs = jnp.where(row < batch, probs, 0.0)

    o_ref[...] += jnp.sum(probs, axis=0, keepdims=True)[None]

    @pl.when(i == pl.num_programs(1) - 1)
    def _finalize():
        o_ref[...] = o_ref[...] * (1.0 / batch)


def rel_model_forward(s_pool, w, b, *, training: bool,
                      dropout_bits=None, dropout_rng=None, dropout_seed: int = 0,
                      use_onchip_prng: bool = False,
                      tile_rows: int = 1024, cast_to_bf16: bool = False):
    """s_pool: (B, 768); w: (2, 768) (PyTorch layout); b: (2,).
    Returns (2,) f32: softmax(Linear(dropout(s_pool)), dim=1).mean(0)."""
    x = jnp.asarray(s_pool)
    B, F = x.shape
    assert F == IN_FEATURES
    if cast_to_bf16:
        x = x.astype(jnp.bfloat16)            # halves eval-path HBM read
    elif x.dtype != jnp.bfloat16:
        x = x.astype(jnp.float32)

    apply_dropout = bool(training) and DROPOUT_P > 0.0

    w_t = jnp.asarray(w, jnp.float32).T                        # (768, 2)
    if apply_dropout:
        w_t = w_t * (1.0 / (1.0 - DROPOUT_P))                  # fold survivor scale into w
    w_t = w_t.astype(x.dtype)                                  # bf16 weights iff bf16 x
    b2 = jnp.asarray(b, jnp.float32).reshape(1, NUM_CLASSES)   # (1, 2)

    # Batch tile: whole batch if it fits (full-dim block, always legal), else a
    # 32-row-aligned tile (works for f32 / bf16 / uint8 sublane tilings).
    # No wrapper jnp.pad -- partial last blocks are handled by Pallas + in-kernel mask.
    tb = min(int(tile_rows), B)
    if tb < B:
        tb = _round_up(tb, 32)
        if tb >= B:
            tb = B
    num_tiles = int(pl.cdiv(B, tb))
    ncores = min(NUM_CORES, num_tiles)
    tpc = int(pl.cdiv(num_tiles, ncores))            # batch tiles per core
    rem = B - (num_tiles - 1) * tb                   # valid rows in last real tile
    need_mask = (rem != tb) or (ncores * tpc > num_tiles)

    clamp = num_tiles - 1

    def tile_map(c, i):
        # clamp so a possible extra grid step on the last core re-reads a valid block;
        # its rows are masked out in-kernel.
        return (jnp.minimum(c * tpc + i, clamp), 0)

    inputs = [x, w_t, b2]
    in_specs = [
        pl.BlockSpec((tb, F), tile_map),
        pl.BlockSpec((F, NUM_CLASSES), lambda c, i: (0, 0)),
        pl.BlockSpec((1, NUM_CLASSES), lambda c, i: (0, 0)),
    ]
    bytes_accessed = (x.size * x.dtype.itemsize + w_t.size * w_t.dtype.itemsize
                      + ncores * NUM_CLASSES * 4)

    has_bits = False
    bits_is_u8 = False
    bits_threshold = 0
    thresh_u8 = min(int(round(DROPOUT_P * 256)), 255)
    thresh_u32 = min(int(round(DROPOUT_P * (1 << 32))), (1 << 32) - 1)

    if apply_dropout and use_onchip_prng:
        # on-chip PRNG (real HW only; no interpret-mode lowering)
        bits_threshold = thresh_u32
    elif apply_dropout:
        if dropout_bits is not None:
            bits = jnp.asarray(dropout_bits)
            assert bits.shape == (B, F)
            assert bits.dtype in (jnp.uint8, jnp.uint32), bits.dtype
            if bits.dtype == jnp.uint8 and tb % 32 == 0:
                bits_is_u8, bits_threshold = True, thresh_u8
            elif bits.dtype == jnp.uint8:
                # widen so the block keeps a 32-bit sublane tiling;
                # (b8 << 24) >= (t8 << 24)  <=>  b8 >= t8  -> identical keep decision
                bits = bits.astype(jnp.uint32) << 24
                bits_is_u8, bits_threshold = False, thresh_u8 << 24
            else:
                bits_is_u8, bits_threshold = False, thresh_u32
        else:
            key = dropout_rng if dropout_rng is not None else jax.random.PRNGKey(dropout_seed)
            if tb % 32 == 0:
                bits = jax.random.bits(key, (B, F), dtype=jnp.uint8)   # 4x less HBM than u32
                bits_is_u8, bits_threshold = True, thresh_u8
            else:
                bits = jax.random.bits(key, (B, F), dtype=jnp.uint32)
                bits_is_u8, bits_threshold = False, thresh_u32
        has_bits = True
        inputs.append(bits)
        in_specs.append(pl.BlockSpec((tb, F), tile_map))
        bytes_accessed += bits.size * bits.dtype.itemsize

    kernel = functools.partial(
        _rel_kernel, apply_dropout=apply_dropout, batch=B, tb=tb, tpc=tpc,
        has_bits=has_bits, bits_is_u8=bits_is_u8, bits_threshold=bits_threshold,
        use_onchip_prng=use_onchip_prng, seed=int(dropout_seed), need_mask=need_mask)

    rows = ncores * tpc * tb
    out = pl.pallas_call(
        kernel,
        out_shape=jax.ShapeDtypeStruct((ncores, 1, NUM_CLASSES), jnp.float32),
        grid_spec=pltpu.PrefetchScalarGridSpec(
            num_scalar_prefetch=0,
            grid=(ncores, tpc),
            in_specs=in_specs,
            # TODO(synk): for sub-512-row tiles on v7x, sweep pipeline_mode=pl.Buffered(3)
            # on the x/bits specs to hide DMA issue latency.
            out_specs=pl.BlockSpec((1, 1, NUM_CLASSES), lambda c, i: (c, 0, 0)),
        ),
        compiler_params=pltpu.CompilerParams(
            dimension_semantics=("parallel", "arbitrary"),
            vmem_limit_bytes=48 * 1024 * 1024,   # < 64 MiB v7x physical; >> tile budget
        ),
        cost_estimate=pl.CostEstimate(
            flops=2 * rows * F * NUM_CLASSES,
            transcendentals=rows * NUM_CLASSES,
            bytes_accessed=int(bytes_accessed),
        ),
    )(*inputs)

    # per-core partials (each already divided by the true batch) -> (2,)
    return out.reshape(ncores, NUM_CLASSES).sum(axis=0)


def _init_params(key):
    # nn.Linear default init: U(-k, k) with k = 1/sqrt(in_features)
    kw, kb = jax.random.split(key)
    bound = 1.0 / (IN_FEATURES ** 0.5)
    w = jax.random.uniform(kw, (NUM_CLASSES, IN_FEATURES), jnp.float32, -bound, bound)
    b = jax.random.uniform(kb, (NUM_CLASSES,), jnp.float32, -bound, bound)
    return w, b


def _reference(s_pool, w, b, keep=None, p=DROPOUT_P):
    x = jnp.asarray(s_pool, jnp.float32)
    if keep is not None:
        x = x * keep.astype(jnp.float32) / (1.0 - p)
    logits = x @ jnp.asarray(w, jnp.float32).T + jnp.asarray(b, jnp.float32)
    return jax.nn.softmax(logits, axis=1).mean(axis=0)


if __name__ == "__main__":
    key = jax.random.PRNGKey(0)
    kx, kp, kd8, kd32, kx2, kx3 = jax.random.split(key, 6)
    w, b = _init_params(kp)

    # ---- eval path, single tile (dropout = identity) ----
    B = 8
    s_pool = jax.random.normal(kx, (B, IN_FEATURES), jnp.float32)
    prob = jax.block_until_ready(rel_model_forward(s_pool, w, b, training=False))
    assert prob.shape == (NUM_CLASSES,)
    assert jnp.allclose(prob, _reference(s_pool, w, b), atol=1e-5, rtol=1e-4)

    # ---- eval path: multi-tile, both grid cores, partial last block, no wrapper pad ----
    B2 = 80
    s_pool2 = jax.random.normal(kx2, (B2, IN_FEATURES), jnp.float32)
    prob2 = jax.block_until_ready(
        rel_model_forward(s_pool2, w, b, training=False, tile_rows=32))
    assert jnp.allclose(prob2, _reference(s_pool2, w, b), atol=1e-5, rtol=1e-4)

    # ---- eval path, bf16 activations/weights (halved HBM read), loose tolerance ----
    prob2_bf16 = jax.block_until_ready(
        rel_model_forward(s_pool2, w, b, training=False, tile_rows=32, cast_to_bf16=True))
    assert jnp.allclose(prob2_bf16, _reference(s_pool2, w, b), atol=2e-2, rtol=2e-2)

    # ---- training path, explicit uint8 dropout bits (reproducible reference) ----
    B3 = 64
    s_pool3 = jax.random.normal(kx3, (B3, IN_FEATURES), jnp.float32)
    bits8 = jax.random.bits(kd8, (B3, IN_FEATURES), dtype=jnp.uint8)
    prob_t8 = jax.block_until_ready(
        rel_model_forward(s_pool3, w, b, training=True, dropout_bits=bits8))
    keep8 = bits8 >= 128                       # keep rule: bits >= round(p * 256)
    assert jnp.allclose(prob_t8, _reference(s_pool3, w, b, keep=keep8),
                        atol=1e-5, rtol=1e-4)

    # ---- training path, explicit uint32 dropout bits (tiny/unaligned-tile fallback) ----
    bits32 = jax.random.bits(kd32, (B, IN_FEATURES), dtype=jnp.uint32)
    prob_t32 = jax.block_until_ready(
        rel_model_forward(s_pool, w, b, training=True, dropout_bits=bits32))
    keep32 = bits32 >= jnp.uint32(1 << 31)     # keep rule: bits >= round(p * 2^32)
    assert jnp.allclose(prob_t32, _reference(s_pool, w, b, keep=keep32),
                        atol=1e-5, rtol=1e-4)

    # ---- training path, on-chip PRNG (zero dropout-mask HBM traffic) ----
    # gated: pltpu.prng_* has no interpret-mode lowering
    if jax.devices()[0].platform == "tpu":
        prob_prng = jax.block_until_ready(rel_model_forward(
            s_pool3, w, b, training=True, use_onchip_prng=True, dropout_seed=123))
        assert prob_prng.shape == (NUM_CLASSES,)
        assert bool(jnp.isfinite(prob_prng).all())
        assert abs(float(prob_prng.sum()) - 1.0) < 1e-3

    print("KERNEL_OK")
</pallas_src>

<mosaic_0001>
module attributes {stable_mosaic.version = 11 : i64} {
  func.func @_rel_kernel(%arg0: i32, %arg1: i32, %arg2: memref<8x768xf32, #tpu.memory_space<vmem>>, %arg3: memref<768x2xf32, #tpu.memory_space<vmem>>, %arg4: memref<1x2xf32, #tpu.memory_space<vmem>>, %arg5: memref<1x1x2xf32, #tpu.memory_space<vmem>>) attributes {dimension_semantics = [#tpu.dimension_semantics<parallel>, #tpu.dimension_semantics<arbitrary>], iteration_bounds = array<i64: 1, 1>, scalar_prefetch = 0 : i64, scratch_operands = 0 : i64, tpu.core_type = #tpu.core_type<tc>, window_params = [{transform_indices = @transform_0, window_bounds = array<i64: 8, 768>}, {pipeline_mode = #tpu.pipeline_mode<synchronous>, transform_indices = @transform_1, window_bounds = array<i64: 768, 2>}, {pipeline_mode = #tpu.pipeline_mode<synchronous>, transform_indices = @transform_2, window_bounds = array<i64: 1, 2>}, {transform_indices = @transform_3, window_bounds = array<i64: 1, 1, 2>}]} {
    %c0_i32 = arith.constant 0 : i32
    %0 = arith.cmpi eq, %arg1, %c0_i32 : i32
    %1 = arith.extui %0 : i1 to i32
    %c0_i32_0 = arith.constant 0 : i32
    %2 = arith.cmpi ne, %1, %c0_i32_0 : i32
    scf.if %2 {
      %cst_17 = arith.constant 0.000000e+00 : f32
      %27 = vector.broadcast %cst_17 : f32 to vector<1x1x2xf32>
      %c0_18 = arith.constant 0 : index
      %c0_19 = arith.constant 0 : index
      %c0_20 = arith.constant 0 : index
      %28 = vector.load %arg5[%c0_18, %c0_19, %c0_20] : memref<1x1x2xf32, #tpu.memory_space<vmem>>, vector<1x1x2xf32>
      tpu.vector_store %arg5[%c0_18, %c0_19, %c0_20], %27 {strides = array<i32>} : memref<1x1x2xf32, #tpu.memory_space<vmem>>, vector<1x1x2xf32>,
    } else {
    }
    %c0 = arith.constant 0 : index
    %c0_1 = arith.constant 0 : index
    %3 = vector.load %arg2[%c0, %c0_1] : memref<8x768xf32, #tpu.memory_space<vmem>>, vector<8x768xf32>
    %c0_2 = arith.constant 0 : index
    %c0_3 = arith.constant 0 : index
    %4 = vector.load %arg3[%c0_2, %c0_3] : memref<768x2xf32, #tpu.memory_space<vmem>>, vector<768x2xf32>
    %cst = arith.constant dense<0.000000e+00> : vector<8x2xf32>
    %5 = tpu.matmul %3, %4, %cst {dimension_numbers = #tpu.dot_dimension_numbers<[1], [0], [0], [1], [0, 0, 1, 1], [], []>} : vector<8x768xf32>, vector<768x2xf32>, vector<8x2xf32> -> vector<8x2xf32>
    %c0_4 = arith.constant 0 : index
    %c0_5 = arith.constant 0 : index
    %6 = vector.load %arg4[%c0_4, %c0_5] : memref<1x2xf32, #tpu.memory_space<vmem>>, vector<1x2xf32>
    %7 = vector.broadcast %6 : vector<1x2xf32> to vector<8x2xf32>
    %8 = arith.addf %5, %7 : vector<8x2xf32>
    %cst_6 = arith.constant dense<0xFF800000> : vector<8xf32>
    %9 = vector.multi_reduction <maximumf>, %8, %cst_6 [1] : vector<8x2xf32> to vector<8xf32>
    %10 = vector.shape_cast %9 : vector<8xf32> to vector<8x1xf32>
    %11 = vector.broadcast %10 : vector<8x1xf32> to vector<8x2xf32>
    %12 = arith.subf %8, %11 : vector<8x2xf32>
    %13 = math.exp %12 : vector<8x2xf32>
    %cst_7 = arith.constant dense<0.000000e+00> : vector<8xf32>
    %14 = vector.multi_reduction <add>, %13, %cst_7 [1] : vector<8x2xf32> to vector<8xf32>
    %15 = vector.shape_cast %14 : vector<8xf32> to vector<8x1xf32>
    %16 = vector.broadcast %15 : vector<8x1xf32> to vector<8x2xf32>
    %17 = arith.divf %13, %16 : vector<8x2xf32>
    %c0_8 = arith.constant 0 : index
    %c0_9 = arith.constant 0 : index
    %c0_10 = arith.constant 0 : index
    %18 = vector.load %arg5[%c0_8, %c0_9, %c0_10] : memref<1x1x2xf32, #tpu.memory_space<vmem>>, vector<1x1x2xf32>
    %cst_11 = arith.constant dense<0.000000e+00> : vector<2xf32>
    %19 = vector.multi_reduction <add>, %17, %cst_11 [0] : vector<8x2xf32> to vector<2xf32>
    %20 = vector.shape_cast %19 : vector<2xf32> to vector<1x2xf32>
    %21 = vector.shape_cast %20 : vector<1x2xf32> to vector<1x1x2xf32>
    %22 = arith.addf %18, %21 : vector<1x1x2xf32>
    %c0_12 = arith.constant 0 : index
    %c0_13 = arith.constant 0 : index
    %c0_14 = arith.constant 0 : index
    %23 = vector.load %arg5[%c0_12, %c0_13, %c0_14] : memref<1x1x2xf32, #tpu.memory_space<vmem>>, vector<1x1x2xf32>
    tpu.vector_store %arg5[%c0_12, %c0_13, %c0_14], %22 {strides = array<i32>} : memref<1x1x2xf32, #tpu.memory_space<vmem>>, vector<1x1x2xf32>,
    %c0_i32_15 = arith.constant 0 : i32
    %24 = arith.cmpi eq, %arg1, %c0_i32_15 : i32
    %25 = arith.extui %24 : i1 to i32
    %c0_i32_16 = arith.constant 0 : i32
    %26 = arith.cmpi ne, %25, %c0_i32_16 : i32
    scf.if %26 {
      %c0_17 = arith.constant 0 : index
      %c0_18 = arith.constant 0 : index
      %c0_19 = arith.constant 0 : index
      %27 = vector.load %arg5[%c0_17, %c0_18, %c0_19] : memref<1x1x2xf32, #tpu.memory_space<vmem>>, vector<1x1x2xf32>
      %cst_20 = arith.constant 1.250000e-01 : f32
      %28 = vector.broadcast %cst_20 : f32 to vector<1x1x2xf32>
      %29 = arith.mulf %27, %28 : vector<1x1x2xf32>
      %c0_21 = arith.constant 0 : index
      %c0_22 = arith.constant 0 : index
      %c0_23 = arith.constant 0 : index
      %30 = vector.load %arg5[%c0_21, %c0_22, %c0_23] : memref<1x1x2xf32, #tpu.memory_space<vmem>>, vector<1x1x2xf32>
      tpu.vector_store %arg5[%c0_21, %c0_22, %c0_23], %29 {strides = array<i32>} : memref<1x1x2xf32, #tpu.memory_space<vmem>>, vector<1x1x2xf32>,
    } else {
    }
    return
  }
  func.func @transform_0(%arg0: i32, %arg1: i32) -> (i32, i32) {
    %c1_i32 = arith.constant 1 : i32
    %0 = arith.muli %arg0, %c1_i32 : i32
    %1 = arith.addi %0, %arg1 : i32
    %c0_i32 = arith.constant 0 : i32
    %2 = arith.minsi %1, %c0_i32 : i32
    %c0_i32_0 = arith.constant 0 : i32
    %c0_i32_1 = arith.constant 0 : i32
    return %2, %c0_i32_0 : i32, i32
  }
  func.func @transform_1(%arg0: i32, %arg1: i32) -> (i32, i32) {
    %c0_i32 = arith.constant 0 : i32
    %c0_i32_0 = arith.constant 0 : i32
    %c0_i32_1 = arith.constant 0 : i32
    return %c0_i32, %c0_i32_0 : i32, i32
  }
  func.func @transform_2(%arg0: i32, %arg1: i32) -> (i32, i32) {
    %c0_i32 = arith.constant 0 : i32
    %c0_i32_0 = arith.constant 0 : i32
    %c0_i32_1 = arith.constant 0 : i32
    return %c0_i32, %c0_i32_0 : i32, i32
  }
  func.func @transform_3(%arg0: i32, %arg1: i32) -> (i32, i32, i32) {
    %c0_i32 = arith.constant 0 : i32
    %c0_i32_0 = arith.constant 0 : i32
    %c0_i32_1 = arith.constant 0 : i32
    return %arg0, %c0_i32, %c0_i32_0 : i32, i32, i32
  }
}

</mosaic_0001>

<bundles_post_ra>
// kernel: tpu_custom_call.1
= control target key start
LH: loop header
LB: loop body
LE: loop exit
PB: predicated region body
PF: predicated region fallthrough
CT: control target
= control target key end

     0   :  { %s1000_s0 = inlined_call_operand.vmem [shape: f32[8,768], index: 0, kind: input, shape index: {}]   ;;  %s1001_s1 = inlined_call_operand.vmem [shape: f32[768,2], index: 1, kind: input, shape index: {}]   ;;  %s1002_s2 = inlined_call_operand.vmem [shape: f32[1,2], index: 2, kind: input, shape index: {}]   ;;  %s1003_s3 = inlined_call_operand.hbm [shape: f32[1,1,2], index: 3, kind: output, shape index: {}]  }
   0x1   :  { %v73_v0 = vld [vmem:[%s1001_s1 + $0x80] sm:$0xff]  ;;  %v74_v1 = vld [vmem:[%s1001_s1 + $0x88] sm:$0xff]  ;;  %v75_v11 = vld [vmem:[%s1001_s1 + $0x90] sm:$0xff] }
   0x2   :  { %v57_v2 = vld [vmem:[%s1001_s1] sm:$0xff]  ;;  %v525_v3 = vpack.c.bf16 %v74_v1, %v73_v0  ;;  %v58_v4 = vld [vmem:[%s1001_s1 + $0x8] sm:$0xff]  ;;  %v76_v13 = vld [vmem:[%s1001_s1 + $0x98] sm:$0xff] }
   0x3   :  { %v105_v5 = vld [vmem:[%s1001_s1 + $0x180] sm:$0xff]  ;;  %v106_v6 = vld [vmem:[%s1001_s1 + $0x188] sm:$0xff]  ;;  %v527_v7 = vpack.c.bf16 %v58_v4, %v57_v2  ;;  %v59_v14 = vld [vmem:[%s1001_s1 + $0x10] sm:$0xff]  ;;  %v529_v16 = vpack.c.bf16 %v76_v13, %v75_v11 }
   0x4   :  { %v557_v8 = vpack.c.bf16 %v106_v6, %v105_v5  ;;  %v89_v9 = vld [vmem:[%s1001_s1 + $0x100] sm:$0xff]  ;;  %v90_v10 = vld [vmem:[%s1001_s1 + $0x108] sm:$0xff]  ;;  %526 = vmatprep.subr.bf16.mxu0 %v525_v3  ;;  %v60_v15 = vld [vmem:[%s1001_s1 + $0x18] sm:$0xff] }
   0x5   :  { %v559_v12 = vpack.c.bf16 %v90_v10, %v89_v9  ;;  %528 = vmatpush3.bf16.msra.mxu0 %v527_v7  ;;  %v531_v17 = vpack.c.bf16 %v60_v15, %v59_v14  ;;  %v107_v18 = vld [vmem:[%s1001_s1 + $0x190] sm:$0xff]  ;;  %v108_v19 = vld [vmem:[%s1001_s1 + $0x198] sm:$0xff]  ;;  %v77_v23 = vld [vmem:[%s1001_s1 + $0xa0] sm:$0xff] }
   0x6   :  { %558 = vmatprep.subr.bf16.mxu1 %v557_v8  ;;  %v91_v20 = vld [vmem:[%s1001_s1 + $0x110] sm:$0xff]  ;;  %v561_v21 = vpack.c.bf16 %v108_v19, %v107_v18  ;;  %v92_v22 = vld [vmem:[%s1001_s1 + $0x118] sm:$0xff]  ;;  %v78_v24 = vld [vmem:[%s1001_s1 + $0xa8] sm:$0xff]  ;;  %530 = vmatprep.subr.bf16.mxu0 %v529_v16 }
   0x7   :  { %560 = vmatpush3.bf16.msra.mxu1 %v559_v12  ;;  %v563_v25 = vpack.c.bf16 %v92_v22, %v91_v20  ;;  %v533_v26 = vpack.c.bf16 %v78_v24, %v77_v23  ;;  %v61_v27 = vld [vmem:[%s1001_s1 + $0x20] sm:$0xff]  ;;  %v62_v28 = vld [vmem:[%s1001_s1 + $0x28] sm:$0xff]  ;;  %v79_v35 = vld [vmem:[%s1001_s1 + $0xb0] sm:$0xff] }
   0x8   :  { %v109_v29 = vld [vmem:[%s1001_s1 + $0x1a0] sm:$0xff]  ;;  %562 = vmatprep.subr.bf16.mxu1 %v561_v21  ;;  %v110_v30 = vld [vmem:[%s1001_s1 + $0x1a8] sm:$0xff]  ;;  %v535_v33 = vpack.c.bf16 %v62_v28, %v61_v27  ;;  %v80_v36 = vld [vmem:[%s1001_s1 + $0xb8] sm:$0xff] }
   0x9   :  { %v93_v31 = vld [vmem:[%s1001_s1 + $0x120] sm:$0xff]  ;;  %v94_v32 = vld [vmem:[%s1001_s1 + $0x128] sm:$0xff]  ;;  %532 = vmatpush3.bf16.msra.mxu0 %v531_v17  ;;  %v565_v34 = vpack.c.bf16 %v110_v30, %v109_v29  ;;  %v63_v37 = vld [vmem:[%s1001_s1 + $0x30] sm:$0xff]  ;;  %v537_v39 = vpack.c.bf16 %v80_v36, %v79_v35 }
   0xa   :  { %534 = vmatprep.subr.bf16.mxu0 %v533_v26  ;;  %v567_v38 = vpack.c.bf16 %v94_v32, %v93_v31  ;;  %v64_v40 = vld [vmem:[%s1001_s1 + $0x38] sm:$0xff]  ;;  %v111_v41 = vld [vmem:[%s1001_s1 + $0x1b0] sm:$0xff]  ;;  %v81_v46 = vld [vmem:[%s1001_s1 + $0xc0] sm:$0xff] }
   0xb   :  { %564 = vmatpush3.bf16.msra.mxu1 %v563_v25  ;;  %v112_v42 = vld [vmem:[%s1001_s1 + $0x1b8] sm:$0xff]  ;;  %v95_v44 = vld [vmem:[%s1001_s1 + $0x130] sm:$0xff]  ;;  %v82_v47 = vld [vmem:[%s1001_s1 + $0xc8] sm:$0xff]  ;;  %v539_v48 = vpack.c.bf16 %v64_v40, %v63_v37 }
   0xc   :  { %566 = vmatprep.subr.bf16.mxu1 %v565_v34  ;;  %v569_v43 = vpack.c.bf16 %v112_v42, %v111_v41  ;;  %v96_v45 = vld [vmem:[%s1001_s1 + $0x138] sm:$0xff]  ;;  %v113_v49 = vld [vmem:[%s1001_s1 + $0x1c0] sm:$0xff]  ;;  %v114_v50 = vld [vmem:[%s1001_s1 + $0x1c8] sm:$0xff]  ;;  %v541_v52 = vpack.c.bf16 %v82_v47, %v81_v46 }
   0xd   :  { %536 = vmatpush3.bf16.msra.mxu0 %v535_v33  ;;  %v571_v51 = vpack.c.bf16 %v96_v45, %v95_v44  ;;  %v65_v53 = vld [vmem:[%s1001_s1 + $0x40] sm:$0xff]  ;;  %v66_v54 = vld [vmem:[%s1001_s1 + $0x48] sm:$0xff]  ;;  %v573_v56 = vpack.c.bf16 %v114_v50, %v113_v49  ;;  %v83_v58 = vld [vmem:[%s1001_s1 + $0xd0] sm:$0xff] }
   0xe   :  { %538 = vmatprep.subr.bf16.mxu0 %v537_v39  ;;  %v97_v55 = vld [vmem:[%s1001_s1 + $0x140] sm:$0xff]  ;;  %v98_v57 = vld [vmem:[%s1001_s1 + $0x148] sm:$0xff]  ;;  %v84_v59 = vld [vmem:[%s1001_s1 + $0xd8] sm:$0xff]  ;;  %v543_v62 = vpack.c.bf16 %v66_v54, %v65_v53 }
   0xf   :  { %568 = vmatpush3.bf16.msra.mxu1 %v567_v38  ;;  %v115_v60 = vld [vmem:[%s1001_s1 + $0x1d0] sm:$0xff]  ;;  %v116_v61 = vld [vmem:[%s1001_s1 + $0x1d8] sm:$0xff]  ;;  %v575_v63 = vpack.c.bf16 %v98_v57, %v97_v55  ;;  %v545_v0 = vpack.c.bf16 %v84_v59, %v83_v58  ;;  %v85_v6 = vld [vmem:[%s1001_s1 + $0xe0] sm:$0xff] }
  0x10   :  { %570 = vmatprep.subr.bf16.mxu1 %v569_v43  ;;  %v67_v1 = vld [vmem:[%s1001_s1 + $0x50] sm:$0xff]  ;;  %v68_v2 = vld [vmem:[%s1001_s1 + $0x58] sm:$0xff]  ;;  %v577_v4 = vpack.c.bf16 %v116_v61, %v115_v60  ;;  %v86_v7 = vld [vmem:[%s1001_s1 + $0xe8] sm:$0xff] }
  0x11   :  { %540 = vmatpush3.bf16.msra.mxu0 %v539_v48  ;;  %v99_v3 = vld [vmem:[%s1001_s1 + $0x150] sm:$0xff]  ;;  %v100_v5 = vld [vmem:[%s1001_s1 + $0x158] sm:$0xff]  ;;  %v117_v8 = vld [vmem:[%s1001_s1 + $0x1e0] sm:$0xff]  ;;  %v547_v10 = vpack.c.bf16 %v68_v2, %v67_v1  ;;  %v549_v14 = vpack.c.bf16 %v86_v7, %v85_v6 }
  0x12   :  { %542 = vmatprep.subr.bf16.mxu0 %v541_v52  ;;  %v118_v9 = vld [vmem:[%s1001_s1 + $0x1e8] sm:$0xff]  ;;  %v69_v11 = vld [vmem:[%s1001_s1 + $0x60] sm:$0xff]  ;;  %v579_v13 = vpack.c.bf16 %v100_v5, %v99_v3  ;;  %v87_v19 = vld [vmem:[%s1001_s1 + $0xf0] sm:$0xff] }
  0x13   :  { %572 = vmatpush3.bf16.msra.mxu1 %v571_v51  ;;  %v52_v12 = vld [vmem:[%s1000_s0 + $0x8] sm:$0xff]  ;;  %v101_v16 = vld [vmem:[%s1001_s1 + $0x160] sm:$0xff]  ;;  %v581_v18 = vpack.c.bf16 %v118_v9, %v117_v8  ;;  %v88_v20 = vld [vmem:[%s1001_s1 + $0xf8] sm:$0xff] }
  0x14   :  { %574 = vmatprep.subr.bf16.mxu1 %v573_v56  ;;  %v70_v15 = vld [vmem:[%s1001_s1 + $0x68] sm:$0xff]  ;;  %224 = vmatprep.mubr.f32.mxu0 %v52_v12  ;;  %v54_v21 = vld [vmem:[%s1000_s0 + $0x18] sm:$0xff]  ;;  %v119_v22 = vld [vmem:[%s1001_s1 + $0x1f0] sm:$0xff]  ;;  %v553_v26 = vpack.c.bf16 %v88_v20, %v87_v19 }
  0x15   :  { %544 = vmatpush3.bf16.msra.mxu0 %v543_v62  ;;  %v102_v17 = vld [vmem:[%s1001_s1 + $0x168] sm:$0xff]  ;;  %v120_v23 = vld [vmem:[%s1001_s1 + $0x1f8] sm:$0xff]  ;;  %294 = vmatprep.mubr.f32.mxu1 %v54_v21  ;;  %v551_v24 = vpack.c.bf16 %v70_v15, %v69_v11  ;;  %v71_v27 = vld [vmem:[%s1001_s1 + $0x70] sm:$0xff] }
  0x16   :  { %546 = vmatprep.subr.bf16.mxu0 %v545_v0  ;;  %v583_v25 = vpack.c.bf16 %v102_v17, %v101_v16  ;;  %v72_v28 = vld [vmem:[%s1001_s1 + $0x78] sm:$0xff]  ;;  %v103_v29 = vld [vmem:[%s1001_s1 + $0x170] sm:$0xff]  ;;  %v585_v30 = vpack.c.bf16 %v120_v23, %v119_v22  ;;  %v137_v32 = vld [vmem:[%s1001_s1 + $0x280] sm:$0xff] }
  0x17   :  { %576 = vmatpush3.bf16.msra.mxu1 %v575_v63  ;;  %v104_v31 = vld [vmem:[%s1001_s1 + $0x178] sm:$0xff]  ;;  %v138_v33 = vld [vmem:[%s1001_s1 + $0x288] sm:$0xff]  ;;  %v555_v34 = vpack.c.bf16 %v72_v28, %v71_v27  ;;  %v121_v37 = vld [vmem:[%s1001_s1 + $0x200] sm:$0xff] }
  0x18   :  { %578 = vmatprep.subr.bf16.mxu1 %v577_v4  ;;  %v587_v35 = vpack.c.bf16 %v104_v31, %v103_v29  ;;  %v589_v36 = vpack.c.bf16 %v138_v33, %v137_v32  ;;  %v122_v38 = vld [vmem:[%s1001_s1 + $0x208] sm:$0xff]  ;;  %v139_v39 = vld [vmem:[%s1001_s1 + $0x290] sm:$0xff]  ;;  %v140_v40 = vld [vmem:[%s1001_s1 + $0x298] sm:$0xff] }
  0x19   :  { %548 = vmatpush3.bf16.msra.mxu0 %v547_v10  ;;  %v51_v41 = vld [vmem:[%s1000_s0] sm:$0xff]  ;;  %v591_v42 = vpack.c.bf16 %v122_v38, %v121_v37  ;;  %v53_v43 = vld [vmem:[%s1000_s0 + $0x10] sm:$0xff]  ;;  %v593_v44 = vpack.c.bf16 %v140_v40, %v139_v39  ;;  %v124_v46 = vld [vmem:[%s1001_s1 + $0x218] sm:$0xff] }
  0x1a   :  { %550 = vmatprep.subr.bf16.mxu0 %v549_v14  ;;  %v123_v45 = vld [vmem:[%s1001_s1 + $0x210] sm:$0xff]  ;;  %v141_v47 = vld [vmem:[%s1001_s1 + $0x2a0] sm:$0xff]  ;;  %v142_v48 = vld [vmem:[%s1001_s1 + $0x2a8] sm:$0xff] }
  0x1b   :  { %580 = vmatpush3.bf16.msra.mxu1 %v579_v13  ;;  %v56_v49 = vld [vmem:[%s1000_s0 + $0x28] sm:$0xff] }
  0x1c   :  { %582 = vmatprep.subr.bf16.mxu1 %v581_v18 }
  0x1d   :  { %552 = vmatpush3.bf16.msra.mxu0 %v551_v24 }
  0x1e   :  { %554 = vmatprep.subr.bf16.mxu0 %v553_v26 }
  0x1f   :  { %584 = vmatpush3.bf16.msra.mxu1 %v583_v25 }
  0x20   :  { %586 = vmatprep.subr.bf16.mxu1 %v585_v30 }
  0x21   :  { %556 = vmatpush3.bf16.msra.mxu0 %v555_v34 }
  0x22   :  { %590 = vmatprep.subr.bf16.mxu0 %v589_v36 }
  0x23   :  { %588 = vmatpush3.bf16.msra.mxu1 %v587_v35 }
  0x24   :  { %8 = vsyncpa [#allocation3], 0  ;;  %225 = vmatmul.mubr.f32.vlgmr.msra.gmra.mrb[0].mxu0 %v51_v41  ;;  %v595_v50 = vpack.c.bf16 %v124_v46, %v123_v45  ;;  %v597_v51 = vpack.c.bf16 %v142_v48, %v141_v47  ;;  %v125_v52 = vld [vmem:[%s1001_s1 + $0x220] sm:$0xff]  ;;  %v126_v53 = vld [vmem:[%s1001_s1 + $0x228] sm:$0xff]  ;;  %vm370_vm0 = vcmask 15360   ;;  %vm49_vm1 = vcmask 8192  }
  0x25   :  { %592 = vmatpush3.bf16.msra.mxu0 %v591_v42  ;;  %364 = vmatprep.mubr.f32.mxu0 %v56_v49  ;;  %v143_v54 = vld [vmem:[%s1001_s1 + $0x2b0] sm:$0xff]  ;;  %v144_v55 = vld [vmem:[%s1001_s1 + $0x2b8] sm:$0xff]  ;;  %v599_v56 = vpack.c.bf16 %v126_v53, %v125_v52  ;;  %v145_v60 = vld [vmem:[%s1001_s1 + $0x2c0] sm:$0xff]  ;;  %v651_v41 = vmov 0.0  }
  0x26   :  { %295 = vmatmul.mubr.f32.vlgmr.msra.gmra.mrb[0].mxu1 %v53_v43  ;;  %594 = vmatprep.subr.bf16.mxu0 %v593_v44  ;;  %v601_v57 = vpack.c.bf16 %v144_v55, %v143_v54  ;;  %v127_v58 = vld [vmem:[%s1001_s1 + $0x230] sm:$0xff]  ;;  %v128_v59 = vld [vmem:[%s1001_s1 + $0x238] sm:$0xff]  ;;  %v146_v61 = vld [vmem:[%s1001_s1 + $0x2c8] sm:$0xff]  ;;  %50 = vst.msk [vmem:[#allocation2] sm:$0x1] %vm49_vm1, %v651_v41 }
  0x27   :  { %v603_v62 = vpack.c.bf16 %v128_v59, %v127_v58  ;;  %v605_v63 = vpack.c.bf16 %v146_v61, %v145_v60  ;;  %v129_v0 = vld [vmem:[%s1001_s1 + $0x240] sm:$0xff]  ;;  %v130_v1 = vld [vmem:[%s1001_s1 + $0x248] sm:$0xff]  ;;  %v147_v2 = vld [vmem:[%s1001_s1 + $0x2d0] sm:$0xff] }
  0x28   :  { %v148_v3 = vld [vmem:[%s1001_s1 + $0x2d8] sm:$0xff]  ;;  %v607_v4 = vpack.c.bf16 %v130_v1, %v129_v0  ;;  %v131_v6 = vld [vmem:[%s1001_s1 + $0x250] sm:$0xff]  ;;  %v149_v8 = vld [vmem:[%s1001_s1 + $0x2e0] sm:$0xff] }
  0x29   :  { %596 = vmatpush3.bf16.msra.mxu0 %v595_v50  ;;  %v609_v5 = vpack.c.bf16 %v148_v3, %v147_v2  ;;  %v132_v7 = vld [vmem:[%s1001_s1 + $0x258] sm:$0xff]  ;;  %v150_v9 = vld [vmem:[%s1001_s1 + $0x2e8] sm:$0xff]  ;;  %v133_v12 = vld [vmem:[%s1001_s1 + $0x260] sm:$0xff] }
  0x2a   :  { %598 = vmatprep.subr.bf16.mxu0 %v597_v51  ;;  %v611_v10 = vpack.c.bf16 %v132_v7, %v131_v6  ;;  %v613_v11 = vpack.c.bf16 %v150_v9, %v149_v8  ;;  %v134_v13 = vld [vmem:[%s1001_s1 + $0x268] sm:$0xff]  ;;  %v151_v14 = vld [vmem:[%s1001_s1 + $0x2f0] sm:$0xff]  ;;  %v152_v15 = vld [vmem:[%s1001_s1 + $0x2f8] sm:$0xff] }
  0x2b   :  { %v615_v16 = vpack.c.bf16 %v134_v13, %v133_v12  ;;  %v617_v17 = vpack.c.bf16 %v152_v15, %v151_v14  ;;  %v135_v18 = vld [vmem:[%s1001_s1 + $0x270] sm:$0xff]  ;;  %v136_v19 = vld [vmem:[%s1001_s1 + $0x278] sm:$0xff]  ;;  %v55_v21 = vld [vmem:[%s1000_s0 + $0x20] sm:$0xff]  ;;  %s652_s0 = smov [#allocation2]  }
  0x2c   :  { %v619_v20 = vpack.c.bf16 %v136_v19, %v135_v18  ;;  %v419_v23 = vld [vmem:[%s1002_s2] ss:$0 sm:$0xff]  ;;  %s405_s1 = sshll.u32 %s652_s0, 4  ;;  %s406_s1 = int_to_ptr.vmem [resolvable:$true] %s405_s1 }
  0x2d   :  { %600 = vmatpush3.bf16.msra.mxu0 %v599_v56  ;;  %v382_v51 = vld [vmem:[#allocation2] sm:$0x1]  ;;  %s627_s2 = scalar_lea.vmem %s406_s1, 16  ;;  %s631_s29 = scalar_lea.vmem %s406_s1, 32 }
  0x2e   :  { %602 = vmatprep.subr.bf16.mxu0 %v601_v57  ;;  %p628_p0 = scmp.ne.s32.totalorder %s406_s1, %s627_s2  ;;  %p632_p1 = scmp.lt.s32.totalorder %s406_s1, %s406_s1 }
  0x2f   :  { %p633_p2 = scmp.lt.s32.totalorder %s631_s29, %s627_s2 }
  0x31   :  { %604 = vmatpush3.bf16.msra.mxu0 %v603_v62  ;;  %p634_p3 = por %p633_p2, %p632_p1 }
  0x32   :  { %606 = vmatprep.subr.bf16.mxu0 %v605_v63 }
  0x33   :  { %p635_p4 = pnand %p634_p3, %p628_p0 }
  0x35   :  { %608 = vmatpush3.bf16.msra.mxu0 %v607_v4 }
  0x36   :  { %610 = vmatprep.subr.bf16.mxu0 %v609_v5 }
  0x39   :  { %612 = vmatpush3.bf16.msra.mxu0 %v611_v10 }
  0x3a   :  { %614 = vmatprep.subr.bf16.mxu0 %v613_v11 }
  0x3d   :  { %616 = vmatpush3.bf16.msra.mxu0 %v615_v16 }
  0x3e   :  { %618 = vmatprep.subr.bf16.mxu0 %v617_v17 }
  0x41   :  { %620 = vmatpush3.bf16.msra.mxu0 %v619_v20 }
  0x44   :  { %365 = vmatmul.mubr.f32.vlgmr.msra.gmra.mrb[2].mxu0 %v55_v21 }
  0xf7   :  { %v452_v22 = vpop.f32.mrb[0].mxu0 }
  0xf8   :  { %v453_v24 = vpop.f32.mrb[1].mxu0 }
  0xf9   :  { %v487_v25 = vpop.f32.mrb[0].mxu1  ;;  %v454_v26 = vadd.f32 %v453_v24, %v452_v22 }
  0xfa   :  { %v488_v27 = vpop.f32.mrb[1].mxu1 }
  0xfb   :  { %v489_v28 = vadd.f32 %v488_v27, %v487_v25  ;;  %v227_v29 = vadd.f32 %v454_v26, %v419_v23 }
  0xfd   :  { %v297_v30 = vadd.f32 %v489_v28, %v227_v29 }
 0x117   :  { %v522_v31 = vpop.f32.mrb[2].mxu0 }
 0x118   :  { %v523_v32 = vpop.f32.mrb[3].mxu0 }
 0x119   :  { %v524_v33 = vadd.f32 %v523_v32, %v522_v31 }
 0x11b   :  { %v367_v34 = vadd.f32 %v524_v33, %v297_v30 }
 0x11d   :  { %v371_v35 = vsel %vm370_vm0, %v367_v34, -inf }
 0x11e   :  { %372 = vmax.xlane.f32.xlu0 %v371_v35 }
 0x1ab   :  { %v373_v36 = vpop.xlane.xlu0 %372 }
 0x1ac   :  { %v374_v37 = vsub.f32 %v367_v34, %v373_v36 }
 0x1ae   :  { %v375_v38 = vmul.f32 1.442695, %v374_v37 }
 0x1b0   :  { %623 = vpow2.f32 %v375_v38 }
 0x1ba   :  { %v624_v39 = vpop.eup %623 }
 0x1bb   :  { %v377_v40 = vsel %vm370_vm0, %v624_v39, 0.0 }
 0x1bc   :  { %378 = vadd.xlane.f32.xlu0 %v377_v40 }
 0x249   :  { %v379_v42 = vpop.xlane.xlu0 %378 }
 0x24a   :  { %625 = vrcp.f32 %v379_v42 }
 0x254   :  { %v626_v43 = vpop.eup %625 }
 0x255   :  { %v381_v44 = vmul.f32 %v626_v43, %v624_v39 }
 0x257   :  { %v383_v45 = vsel %vm370_vm0, %v381_v44, 0.0 }
 0x258   :  { %v384_v46 = vrot.slane %v383_v45, 4 }
 0x25a   :  { %v385_v47 = vadd.f32 %v384_v46, %v383_v45 }
 0x25c   :  { %v386_v48 = vrot.slane %v385_v47, 2 }
 0x25e   :  { %v387_v49 = vadd.f32 %v386_v48, %v385_v47 }
 0x260   :  { %v388_v50 = vrot.slane %v387_v49, 1 }
 0x262   :  { %v389_v52 = vadd.f32 %v388_v50, %v387_v49 }
 0x264   :  { %v390_v53 = vadd.f32 %v389_v52, %v382_v51 }
 0x266   :  { %392 = vst.msk [vmem:[#allocation2] sm:$0x1] %vm49_vm1, %v390_v53 }
 0x26d   :  { %v396_v54 = vld [vmem:[#allocation2] sm:$0x1] }
 0x26e   :  { %v397_v55 = vmul.f32 0.125, %v396_v54 }
 0x270   :  { %398 = vst.msk [vmem:[#allocation2] sm:$0x1] %vm49_vm1, %v397_v55 }
 0x271   :  { %638 = shalt.err (!%p635_p4)
}
 0x272   :  { %s639_s5 = scalar_lea.hbm %s1003_s3, 16 }
 0x273   :  { %p640_p5 = scmp.ne.s32.totalorder %s1003_s3, %s639_s5  ;;  %p643_p6 = scmp.lt.u32.totalorder %s639_s5, %s1003_s3 }
 0x275   :  { %p645_p7 = pnand %p643_p6, %p640_p5 }
 0x277   :  { %648 = shalt.err (!%p645_p7)
}
 0x278   :  { %408 = dma.vmem_to_hbm [thread:$0]  %s406_s1, 16, %s1003_s3, [#allocation3]  }
 0x279   :  { %649 = dma.done.wait [#allocation3], 16  }
 0x27a   :  { %650 = vsyncadd [#allocation3], 4294967280 }
 0x27b   :  { %412 = vsyncpa [#allocation3], 1 }

</bundles_post_ra>
